<compile_context>
chip_gen: v6e
topology: v6e:2x2x1
jax: 0.10.0
libtpu: 0.0.40
codegen_flags: <defaults>
</compile_context>

<pallas_src>
import functools

import jax
import jax.numpy as jnp
from jax import lax
from jax.experimental import pallas as pl
from jax.experimental.pallas import tpu as pltpu


# --------------------------------------------------------------------------- #
# helpers
# --------------------------------------------------------------------------- #
def _round_up(n: int, m: int) -> int:
    return ((n + m - 1) // m) * m


def _cdiv(n: int, m: int) -> int:
    return (n + m - 1) // m


def _vmem_capacity_bytes() -> int:
    """Physical per-core VMEM; conservative fallback if the query fails."""
    try:
        cap = int(pltpu.get_tpu_info().vmem_capacity_bytes)
        if cap > 0:
            return cap
    except Exception:  # noqa: BLE001 - safe constant fallback only
        pass
    return 64 * 1024 * 1024  # v7x per-TC size: safe on every generation


def _largest_aligned_divisor(total: int, upper: int, align: int = 128) -> int:
    """Largest multiple-of-`align` divisor of `total` that is <= upper.

    `total` must be a multiple of `align` (so `align` itself always works).
    """
    best = align
    c = align
    limit = min(total, max(upper, align))
    while c <= limit:
        if total % c == 0:
            best = c
        c += align
    return best


_SQRT_HALF = 0.7071067811865476
_SQRT_2_OVER_PI = 0.7978845608028654


# --------------------------------------------------------------------------- #
# kernel
# --------------------------------------------------------------------------- #
def _glu_kernel(x_ref, wx_ref, wg_ref, bx_ref, bg_ref, o_ref,
                accx_ref, accg_ref, *, approximate: bool, mxu_dtype):
    # Grid = (row tiles, output-column tiles, reduction tiles)   (K innermost)
    # x_ref : (tm, tk)      activation tile (native dtype)
    # wx/wg : (tk, tn)      value / gate weight tiles (pre-transposed, padded)
    # bx/bg : (1,  tn)      value / gate bias tiles
    # o_ref : (tm, tn)      output tile (lane-dense except the ragged edge)
    # acc*  : (tm, tn) f32  accumulators resident across the K sweep
    k = pl.program_id(2)

    @pl.when(k == 0)
    def _init():
        accx_ref[...] = jnp.zeros_like(accx_ref)
        accg_ref[...] = jnp.zeros_like(accg_ref)

    x = x_ref[...]
    if mxu_dtype is not None:
        x = x.astype(mxu_dtype)          # bf16 MXU feed; accumulation stays f32
    accx_ref[...] += jnp.dot(x, wx_ref[...], preferred_element_type=jnp.float32)
    accg_ref[...] += jnp.dot(x, wg_ref[...], preferred_element_type=jnp.float32)

    @pl.when(k == pl.num_programs(2) - 1)
    def _finalize():
        h = accx_ref[...] + bx_ref[...].astype(jnp.float32)
        g = accg_ref[...] + bg_ref[...].astype(jnp.float32)
        if approximate:
            # tanh-approx GELU: transcendental goes to the EUP slot (cheap when
            # the kernel is VALU-bound, e.g. small dim_in).
            inner = jnp.float32(_SQRT_2_OVER_PI) * (g + jnp.float32(0.044715) * g * g * g)
            gelu_g = 0.5 * g * (1.0 + jnp.tanh(inner))
        else:
            # exact erf GELU (matches torch.nn.GELU() default numerics).
            gelu_g = 0.5 * g * (1.0 + lax.erf(g * jnp.float32(_SQRT_HALF)))
        o_ref[...] = (h * gelu_g).astype(o_ref.dtype)


# --------------------------------------------------------------------------- #
# wrapper
# --------------------------------------------------------------------------- #
def pack_glu_params(weight, bias, dim_out, *, mxu_dtype=None):
    """Pre-pack nn.Linear(dim_in, 2*dim_out) parameters for the kernel.

    Call ONCE and reuse: the transpose / 128-lane pad / value-gate split is
    not something we want to pay on every forward pass.
    weight: [2*dim_out, dim_in], bias: [2*dim_out]   (PyTorch Linear layout)
    """
    two_do, dim_in = weight.shape
    assert two_do == 2 * dim_out, "weight must be Linear(dim_in, 2*dim_out).weight"
    dim_out_p = _round_up(dim_out, 128)   # lane-dense weight columns / stores
    pad = dim_out_p - dim_out

    w_t = weight.T                                      # y = x @ W.T + b
    wx = jnp.pad(w_t[:, :dim_out], ((0, 0), (0, pad)))  # value half
    wg = jnp.pad(w_t[:, dim_out:], ((0, 0), (0, pad)))  # gate  half
    bx = jnp.pad(bias[:dim_out], (0, pad)).reshape(1, dim_out_p)
    bg = jnp.pad(bias[dim_out:], (0, pad)).reshape(1, dim_out_p)

    if mxu_dtype is not None:
        wx = wx.astype(mxu_dtype)
        wg = wg.astype(mxu_dtype)

    return dict(wx=wx, wg=wg, bx=bx, bg=bg, dim_in=dim_in, dim_out=dim_out,
                dim_out_p=dim_out_p, mxu_dtype=mxu_dtype)


def glu_apply(params, x, *, tm=512, approximate=False):
    """Apply GLU with pre-packed params.  x: [..., dim_in] -> [..., dim_out]."""
    dim_in = params["dim_in"]
    dim_out = params["dim_out"]
    dim_out_p = params["dim_out_p"]
    wx, wg, bx, bg = params["wx"], params["wg"], params["bx"], params["bg"]
    mxu_dtype = params["mxu_dtype"]

    orig_shape = x.shape
    assert orig_shape[-1] == dim_in
    x2d = x.reshape(-1, dim_in)                     # free (contiguous reshape)
    M = x2d.shape[0]

    x_bytes = jnp.dtype(x.dtype).itemsize
    w_bytes = jnp.dtype(wx.dtype).itemsize
    b_bytes = jnp.dtype(bx.dtype).itemsize
    o_bytes = x_bytes

    # sublane packing of the row axis for this dtype (f32:8, bf16:16, 8-bit:32)
    sub = {4: 8, 2: 16, 1: 32}.get(x_bytes, 8)

    # ---- generation-aware VMEM policy --------------------------------------
    vmem_cap = _vmem_capacity_bytes()
    vmem_budget = int(0.80 * vmem_cap)        # ~51 MiB v7x, ~102 MiB v5e/v6e
    vmem_limit_cap = int(0.875 * vmem_cap)    # never request > ~7/8 physical

    # ---- tile selection ------------------------------------------------------
    tm_eff = min(max(sub, _round_up(tm, sub)), _round_up(M, sub))
    tn = dim_out_p
    tk = dim_in
    if dim_in > 2048 and dim_in % 128 == 0:
        # K-tile very large reductions (P3 accumulator pattern); tk must divide
        # dim_in exactly so no garbage rows enter the accumulation.
        tk = _largest_aligned_divisor(dim_in, 1024)

    def est(tm_, tn_, tk_):
        return (2 * tm_ * tk_ * x_bytes            # x tiles, double-buffered
                + 2 * 2 * tk_ * tn_ * w_bytes      # wx + wg tiles, double-buffered
                + 2 * 2 * tn_ * b_bytes            # bx + bg tiles
                + 2 * tm_ * tn_ * o_bytes          # out tiles, double-buffered
                + 2 * tm_ * tn_ * 4)               # f32 accumulator scratch

    # Shrink N first (bounds the weight block and the f32 accumulators),
    # then M, then K.  Each step strictly shrinks a tile, so this terminates.
    while est(tm_eff, tn, tk) > vmem_budget:
        if tn > 128:
            new_tn = _largest_aligned_divisor(dim_out_p, max(128, tn // 2))
            if new_tn < tn:
                tn = new_tn
                continue
        if tm_eff > sub:
            tm_eff = max(sub, _round_up(tm_eff // 2, sub))
            continue
        if tk > 128 and dim_in % 128 == 0:
            new_tk = _largest_aligned_divisor(dim_in, max(128, tk // 2))
            if new_tk < tk:
                tk = new_tk
                continue
        break

    nm = _cdiv(M, tm_eff)
    nn = dim_out_p // tn
    nk = _cdiv(dim_in, tk)

    # v7x has 2 TensorCores: make sure the parallel portion of the grid has at
    # least 2 steps when the row count allows it.
    if nm * nn < 2 and M >= 2 * sub:
        tm_eff = _round_up(_cdiv(M, 2), sub)
        nm = _cdiv(M, tm_eff)

    # ---- compiler params / cost estimate ------------------------------------
    comp_kwargs = dict(dimension_semantics=("parallel", "parallel", "arbitrary"))
    est_bytes = est(tm_eff, tn, tk)
    if est_bytes > 16 * 1024 * 1024:   # smallest scoped default (v5e = 16 MiB)
        comp_kwargs["vmem_limit_bytes"] = int(
            min(max(est_bytes * 3 // 2, 32 * 1024 * 1024), vmem_limit_cap))
    compiler_params = pltpu.CompilerParams(**comp_kwargs)

    cost = pl.CostEstimate(
        flops=2 * M * dim_in * 2 * dim_out_p,
        transcendentals=(M * dim_out_p) if approximate else 0,
        bytes_accessed=(x2d.size * x_bytes + wx.size * w_bytes + wg.size * w_bytes
                        + bx.size * b_bytes + bg.size * b_bytes
                        + M * dim_out * o_bytes),
    )

    kernel = functools.partial(_glu_kernel, approximate=approximate,
                               mxu_dtype=mxu_dtype)

    out2d = pl.pallas_call(
        kernel,
        out_shape=jax.ShapeDtypeStruct((M, dim_out), x.dtype),
        grid_spec=pltpu.PrefetchScalarGridSpec(
            num_scalar_prefetch=0,
            grid=(nm, nn, nk),
            in_specs=[
                pl.BlockSpec((tm_eff, tk), lambda i, j, k: (i, k)),   # x
                pl.BlockSpec((tk, tn), lambda i, j, k: (k, j)),       # W value
                pl.BlockSpec((tk, tn), lambda i, j, k: (k, j)),       # W gate
                pl.BlockSpec((1, tn), lambda i, j, k: (0, j)),        # b value
                pl.BlockSpec((1, tn), lambda i, j, k: (0, j)),        # b gate
            ],
            out_specs=pl.BlockSpec((tm_eff, tn), lambda i, j, k: (i, j)),
            scratch_shapes=[pltpu.VMEM((tm_eff, tn), jnp.float32),
                            pltpu.VMEM((tm_eff, tn), jnp.float32)],
        ),
        compiler_params=compiler_params,
        cost_estimate=cost,
    )(x2d, wx, wg, bx, bg)

    return out2d.reshape(*orig_shape[:-1], dim_out)


def glu_forward(x, weight, bias, *, dim_out, tm=512, approximate=False,
                mxu_dtype=None):
    """One-shot convenience wrapper (packs params every call; prefer
    pack_glu_params + glu_apply when the layer is applied repeatedly)."""
    params = pack_glu_params(weight, bias, dim_out, mxu_dtype=mxu_dtype)
    return glu_apply(params, x, tm=tm, approximate=approximate)


# --------------------------------------------------------------------------- #
# reference + test
# --------------------------------------------------------------------------- #
def _reference(x, weight, bias, dim_out, approximate=False):
    h = jnp.einsum("...i,oi->...o", x, weight) + bias
    xp, gate = h[..., :dim_out], h[..., dim_out:]
    return xp * jax.nn.gelu(gate, approximate=approximate)


if __name__ == "__main__":
    # small shapes consistent with GLU on a token stream: [B, S, dim_in]
    B, S, dim_in, dim_out = 2, 8, 32, 32

    key = jax.random.PRNGKey(0)
    kx, kw, kb, kx2 = jax.random.split(key, 4)

    x = jax.random.normal(kx, (B, S, dim_in), dtype=jnp.float32)
    bound = 1.0 / jnp.sqrt(dim_in)      # nn.Linear(dim_in, 2*dim_out) init range
    weight = jax.random.uniform(kw, (2 * dim_out, dim_in),
                                minval=-bound, maxval=bound, dtype=jnp.float32)
    bias = jax.random.uniform(kb, (2 * dim_out,),
                              minval=-bound, maxval=bound, dtype=jnp.float32)

    # Pack once, reuse across calls (perf-review item: no per-call repacking).
    params = pack_glu_params(weight, bias, dim_out)

    # 1) main path (exact erf GELU, f32)
    out = jax.block_until_ready(glu_apply(params, x))
    ref = _reference(x, weight, bias, dim_out, approximate=False)
    assert out.shape == (B, S, dim_out)
    assert jnp.allclose(out, ref, atol=1e-5, rtol=1e-5), "mismatch (exact GELU)"

    # 2) ragged row count -> Pallas masks the final partial row block (no padding pass)
    x_ragged = jax.random.normal(kx2, (3, 5, dim_in), dtype=jnp.float32)
    out_r = jax.block_until_ready(glu_apply(params, x_ragged))
    ref_r = _reference(x_ragged, weight, bias, dim_out, approximate=False)
    assert out_r.shape == (3, 5, dim_out)
    assert jnp.allclose(out_r, ref_r, atol=1e-5, rtol=1e-5), "mismatch (ragged M)"

    # 3) optional EUP-routed tanh-approx GELU path
    out_a = jax.block_until_ready(glu_apply(params, x, approximate=True))
    ref_a = _reference(x, weight, bias, dim_out, approximate=True)
    assert jnp.allclose(out_a, ref_a, atol=1e-4, rtol=1e-4), "mismatch (tanh GELU)"

    # 4) optional bf16 MXU operands (f32 accumulation + epilogue)
    params_bf16 = pack_glu_params(weight, bias, dim_out, mxu_dtype=jnp.bfloat16)
    out_b = jax.block_until_ready(glu_apply(params_bf16, x))
    assert jnp.allclose(out_b, ref, atol=1e-1, rtol=1e-1), "mismatch (bf16 MXU)"

    print("KERNEL_OK")
</pallas_src>

<mosaic_0001>
module attributes {stable_mosaic.version = 11 : i64} {
  func.func @_glu_kernel(%arg0: i32, %arg1: i32, %arg2: i32, %arg3: memref<8x32xf32, #tpu.memory_space<vmem>>, %arg4: memref<32x128xf32, #tpu.memory_space<vmem>>, %arg5: memref<32x128xf32, #tpu.memory_space<vmem>>, %arg6: memref<1x128xf32, #tpu.memory_space<vmem>>, %arg7: memref<1x128xf32, #tpu.memory_space<vmem>>, %arg8: memref<8x128xf32, #tpu.memory_space<vmem>>, %arg9: memref<8x128xf32, #tpu.memory_space<vmem>>, %arg10: memref<8x128xf32, #tpu.memory_space<vmem>>) attributes {dimension_semantics = [#tpu.dimension_semantics<parallel>, #tpu.dimension_semantics<parallel>, #tpu.dimension_semantics<arbitrary>], iteration_bounds = array<i64: 2, 1, 1>, scalar_prefetch = 0 : i64, scratch_operands = 2 : i64, tpu.core_type = #tpu.core_type<tc>, window_params = [{transform_indices = @transform_0, window_bounds = array<i64: 8, 32>}, {transform_indices = @transform_1, window_bounds = array<i64: 32, 128>}, {transform_indices = @transform_2, window_bounds = array<i64: 32, 128>}, {transform_indices = @transform_3, window_bounds = array<i64: 1, 128>}, {transform_indices = @transform_4, window_bounds = array<i64: 1, 128>}, {transform_indices = @transform_5, window_bounds = array<i64: 8, 128>}]} {
    %c0_i32 = arith.constant 0 : i32
    %0 = arith.cmpi eq, %arg2, %c0_i32 : i32
    %1 = arith.extui %0 : i1 to i32
    %c0_i32_0 = arith.constant 0 : i32
    %2 = arith.cmpi ne, %1, %c0_i32_0 : i32
    scf.if %2 {
      %cst_17 = arith.constant 0.000000e+00 : f32
      %17 = vector.broadcast %cst_17 : f32 to vector<8x128xf32>
      %c0_18 = arith.constant 0 : index
      %c0_19 = arith.constant 0 : index
      %18 = vector.load %arg9[%c0_18, %c0_19] : memref<8x128xf32, #tpu.memory_space<vmem>>, vector<8x128xf32>
      tpu.vector_store %arg9[%c0_18, %c0_19], %17 {strides = array<i32>} : memref<8x128xf32, #tpu.memory_space<vmem>>, vector<8x128xf32>,
      %cst_20 = arith.constant 0.000000e+00 : f32
      %19 = vector.broadcast %cst_20 : f32 to vector<8x128xf32>
      %c0_21 = arith.constant 0 : index
      %c0_22 = arith.constant 0 : index
      %20 = vector.load %arg10[%c0_21, %c0_22] : memref<8x128xf32, #tpu.memory_space<vmem>>, vector<8x128xf32>
      tpu.vector_store %arg10[%c0_21, %c0_22], %19 {strides = array<i32>} : memref<8x128xf32, #tpu.memory_space<vmem>>, vector<8x128xf32>,
    } else {
    }
    %c0 = arith.constant 0 : index
    %c0_1 = arith.constant 0 : index
    %3 = vector.load %arg3[%c0, %c0_1] : memref<8x32xf32, #tpu.memory_space<vmem>>, vector<8x32xf32>
    %c0_2 = arith.constant 0 : index
    %c0_3 = arith.constant 0 : index
    %4 = vector.load %arg9[%c0_2, %c0_3] : memref<8x128xf32, #tpu.memory_space<vmem>>, vector<8x128xf32>
    %c0_4 = arith.constant 0 : index
    %c0_5 = arith.constant 0 : index
    %5 = vector.load %arg4[%c0_4, %c0_5] : memref<32x128xf32, #tpu.memory_space<vmem>>, vector<32x128xf32>
    %cst = arith.constant dense<0.000000e+00> : vector<8x128xf32>
    %6 = tpu.matmul %3, %5, %cst {dimension_numbers = #tpu.dot_dimension_numbers<[1], [0], [0], [1], [0, 0, 1, 1], [], []>} : vector<8x32xf32>, vector<32x128xf32>, vector<8x128xf32> -> vector<8x128xf32>
    %7 = arith.addf %4, %6 : vector<8x128xf32>
    %c0_6 = arith.constant 0 : index
    %c0_7 = arith.constant 0 : index
    %8 = vector.load %arg9[%c0_6, %c0_7] : memref<8x128xf32, #tpu.memory_space<vmem>>, vector<8x128xf32>
    tpu.vector_store %arg9[%c0_6, %c0_7], %7 {strides = array<i32>} : memref<8x128xf32, #tpu.memory_space<vmem>>, vector<8x128xf32>,
    %c0_8 = arith.constant 0 : index
    %c0_9 = arith.constant 0 : index
    %9 = vector.load %arg10[%c0_8, %c0_9] : memref<8x128xf32, #tpu.memory_space<vmem>>, vector<8x128xf32>
    %c0_10 = arith.constant 0 : index
    %c0_11 = arith.constant 0 : index
    %10 = vector.load %arg5[%c0_10, %c0_11] : memref<32x128xf32, #tpu.memory_space<vmem>>, vector<32x128xf32>
    %cst_12 = arith.constant dense<0.000000e+00> : vector<8x128xf32>
    %11 = tpu.matmul %3, %10, %cst_12 {dimension_numbers = #tpu.dot_dimension_numbers<[1], [0], [0], [1], [0, 0, 1, 1], [], []>} : vector<8x32xf32>, vector<32x128xf32>, vector<8x128xf32> -> vector<8x128xf32>
    %12 = arith.addf %9, %11 : vector<8x128xf32>
    %c0_13 = arith.constant 0 : index
    %c0_14 = arith.constant 0 : index
    %13 = vector.load %arg10[%c0_13, %c0_14] : memref<8x128xf32, #tpu.memory_space<vmem>>, vector<8x128xf32>
    tpu.vector_store %arg10[%c0_13, %c0_14], %12 {strides = array<i32>} : memref<8x128xf32, #tpu.memory_space<vmem>>, vector<8x128xf32>,
    %c0_i32_15 = arith.constant 0 : i32
    %14 = arith.cmpi eq, %arg2, %c0_i32_15 : i32
    %15 = arith.extui %14 : i1 to i32
    %c0_i32_16 = arith.constant 0 : i32
    %16 = arith.cmpi ne, %15, %c0_i32_16 : i32
    scf.if %16 {
      %c0_17 = arith.constant 0 : index
      %c0_18 = arith.constant 0 : index
      %17 = vector.load %arg9[%c0_17, %c0_18] : memref<8x128xf32, #tpu.memory_space<vmem>>, vector<8x128xf32>
      %c0_19 = arith.constant 0 : index
      %c0_20 = arith.constant 0 : index
      %18 = vector.load %arg6[%c0_19, %c0_20] : memref<1x128xf32, #tpu.memory_space<vmem>>, vector<1x128xf32>
      %19 = vector.broadcast %18 : vector<1x128xf32> to vector<8x128xf32>
      %20 = arith.addf %17, %19 : vector<8x128xf32>
      %c0_21 = arith.constant 0 : index
      %c0_22 = arith.constant 0 : index
      %21 = vector.load %arg10[%c0_21, %c0_22] : memref<8x128xf32, #tpu.memory_space<vmem>>, vector<8x128xf32>
      %c0_23 = arith.constant 0 : index
      %c0_24 = arith.constant 0 : index
      %22 = vector.load %arg7[%c0_23, %c0_24] : memref<1x128xf32, #tpu.memory_space<vmem>>, vector<1x128xf32>
      %23 = vector.broadcast %22 : vector<1x128xf32> to vector<8x128xf32>
      %24 = arith.addf %21, %23 : vector<8x128xf32>
      %cst_25 = arith.constant 5.000000e-01 : f32
      %25 = vector.broadcast %cst_25 : f32 to vector<8x128xf32>
      %26 = arith.mulf %25, %24 : vector<8x128xf32>
      %cst_26 = arith.constant 0.707106769 : f32
      %27 = vector.broadcast %cst_26 : f32 to vector<8x128xf32>
      %28 = arith.mulf %24, %27 : vector<8x128xf32>
      %29 = math.erf %28 : vector<8x128xf32>
      %cst_27 = arith.constant 1.000000e+00 : f32
      %30 = vector.broadcast %cst_27 : f32 to vector<8x128xf32>
      %31 = arith.addf %30, %29 : vector<8x128xf32>
      %32 = arith.mulf %26, %31 : vector<8x128xf32>
      %33 = arith.mulf %20, %32 : vector<8x128xf32>
      %c0_28 = arith.constant 0 : index
      %c0_29 = arith.constant 0 : index
      %34 = vector.load %arg8[%c0_28, %c0_29] : memref<8x128xf32, #tpu.memory_space<vmem>>, vector<8x128xf32>
      tpu.vector_store %arg8[%c0_28, %c0_29], %33 {strides = array<i32>} : memref<8x128xf32, #tpu.memory_space<vmem>>, vector<8x128xf32>,
    } else {
    }
    return
  }
  func.func @transform_0(%arg0: i32, %arg1: i32, %arg2: i32) -> (i32, i32) {
    %c0_i32 = arith.constant 0 : i32
    return %arg0, %arg2 : i32, i32
  }
  func.func @transform_1(%arg0: i32, %arg1: i32, %arg2: i32) -> (i32, i32) {
    %c0_i32 = arith.constant 0 : i32
    return %arg2, %arg1 : i32, i32
  }
  func.func @transform_2(%arg0: i32, %arg1: i32, %arg2: i32) -> (i32, i32) {
    %c0_i32 = arith.constant 0 : i32
    return %arg2, %arg1 : i32, i32
  }
  func.func @transform_3(%arg0: i32, %arg1: i32, %arg2: i32) -> (i32, i32) {
    %c0_i32 = arith.constant 0 : i32
    %c0_i32_0 = arith.constant 0 : i32
    return %c0_i32, %arg1 : i32, i32
  }
  func.func @transform_4(%arg0: i32, %arg1: i32, %arg2: i32) -> (i32, i32) {
    %c0_i32 = arith.constant 0 : i32
    %c0_i32_0 = arith.constant 0 : i32
    return %c0_i32, %arg1 : i32, i32
  }
  func.func @transform_5(%arg0: i32, %arg1: i32, %arg2: i32) -> (i32, i32) {
    %c0_i32 = arith.constant 0 : i32
    return %arg0, %arg1 : i32, i32
  }
}

</mosaic_0001>

<bundles_post_ra>
// kernel: tpu_custom_call.1
= control target key start
LH: loop header
LB: loop body
LE: loop exit
PB: predicated region body
PF: predicated region fallthrough
CT: control target
= control target key end

     0   :  { %s1219_s0 = inlined_call_operand.hbm [shape: f32[16,32], index: 0, kind: input, shape index: {}]   ;;  %s1220_s1 = inlined_call_operand.hbm [shape: f32[32,128], index: 1, kind: input, shape index: {}]   ;;  %s1221_s2 = inlined_call_operand.hbm [shape: f32[32,128], index: 2, kind: input, shape index: {}]   ;;  %s1222_s3 = inlined_call_operand.vmem [shape: f32[1,128], index: 3, kind: input, shape index: {}]   ;;  %s1223_s4 = inlined_call_operand.vmem [shape: f32[1,128], index: 4, kind: input, shape index: {}]   ;;  %s1224_s5 = inlined_call_operand.hbm [shape: f32[16,32], index: 5, kind: output, shape index: {}]  }
   0x1   :  { %1228 = sst [smem:[#allocation14_spill]] %s1220_s1 }
   0x2   :  { %10 = vsyncpa [#allocation5], 0 }
   0x3   :  { %12 = vsyncpa [#allocation5 + $0x1], 0 }
   0x4   :  { %13 = vsyncpa [#allocation8], 0 }
   0x5   :  { %14 = vsyncpa [#allocation6], 0 }
   0x6   :  { %16 = vsyncpa [#allocation6 + $0x1], 0  ;;  %s1035_s18 = smov 0   ;;  %s1037_s19 = smov 0  }
   0x7   :  { %s1039_s20 = smov 0   ;;  %s1041_s21 = smov 0  }
   0x8   :  { %s1043_s22 = smov 0   ;;  %s1045_s23 = smov 0  }
   0x9 LB: > { %s687_s24 = sadd.s32 4294967295, %s995_s23   ;;  %s688_s25 = sadd.s32 4294967294, %s995_s23   ;;  %s995_s23 = sphi %s1045_s23, %s22_s23   ;;  %s991_s22 = sphi %s1043_s22, %s1246_s22   ;;  %s987_s21 = sphi %s1041_s21, %s1245_s21   ;;  %s983_s20 = sphi %s1039_s20, %s1244_s20   ;;  %s979_s19 = sphi %s1037_s19, %s1243_s19   ;;  %s975_s18 = sphi %s1035_s18, %s1242_s18  }
   0xa   : > { %p63_p0 = scmp.ne.s32.totalorder %s979_s19, %s975_s18  ;;  %p1069_p1 = scmp.eq.s32.totalorder %s687_s24, 0 }
   0xb   : > { %p1073_p2 = scmp.eq.s32.totalorder %s687_s24, 1  ;;  %p203_p3 = scmp.eq.s32.totalorder %s688_s25, 1 }
   0xc   : > { %s1229_s26 = scalar_select %p1069_p1, 1, 0 }
   0xd   : > { %p1079_p4 = por %p1069_p1, %p63_p0  ;;  %p689_p5 = scmp.ge.s32.totalorder %s995_s23, 1 }
   0xe   : > { %p1084_p6 = por %p203_p3, %p63_p0  ;;  %p210_p7 = scmp.lt.s32.totalorder %s995_s23, 3 }
   0xf   : > { %s1231_s28 = scalar_select %p1079_p4, 1, 0 }
  0x10   : > { %s1232_s29 = scalar_select %p1084_p6, 1, 0 }
  0x11   : > { %p1089_p8 = pnand %p689_p5, %p210_p7  ;;  %s997_s6 = smov [#allocation7]  }
  0x12   : > { %s226_s7 = sshll.u32 %s997_s6, 4  ;;  %s998_s9 = smov [#allocation9]   ;;  %s227_s7 = int_to_ptr.vmem [resolvable:$true] %s226_s7 }
  0x13   : > { %p754_p9 = pneg %p1089_p8  ;;  %s243_s10 = sshll.u32 %s998_s9, 4  ;;  %s244_s10 = int_to_ptr.vmem [resolvable:$true] %s243_s10 }
  0x14   : > { %s842_s11 = scalar_lea.vmem %s227_s7, 512  ;;  %p850_p5 = scmp.lt.s32.totalorder %s227_s7, %s227_s7 }
  0x15   : > { %p1098_p11 = pnand %p754_p9, %p1069_p1  ;;  %p843_p13 = scmp.ne.s32.totalorder %s227_s7, %s842_s11 }
  0x16   : > { %p851_p7 = scmp.lt.s32.totalorder %s842_s11, %s842_s11 }
  0x17   : > { %p833_p12 = pneg %p1098_p11 }
  0x18   : > { %p852_p10 = por %p851_p7, %p850_p5 }
  0x19   : > { %p845_p0 = pnand %p843_p13, %p833_p12 }
  0x1b   : > { %p846_p3 = pneg %p845_p0 }
  0x1d   : > { %p853_p9 = pnand %p852_p10, %p846_p3 }
  0x1f   : > { %856 = shalt.err (!%p853_p9)
}
  0x20   : > { %s999_s12 = smov 128   ;;  %s1000_s13 = smov 8  }
  0x21   : > { %s1235_s1 = sld [smem:[#allocation14_spill]]  ;;  %s868_s16 = scalar_lea.vmem %s244_s10, 512 }
  0x22   : > { %p869_p6 = scmp.ne.s32.totalorder %s244_s10, %s868_s16  ;;  %p876_p1 = scmp.lt.s32.totalorder %s244_s10, %s244_s10 }
  0x23   : > { %p877_p4 = scmp.lt.s32.totalorder %s868_s16, %s868_s16 }
  0x24   : > { %p871_p13 = pnand %p869_p6, %p833_p12 }
  0x25   : > { %p878_p5 = por %p877_p4, %p876_p1 }
  0x26   : > { %p872_p0 = pneg %p871_p13 }
  0x27   : > { %757 = dma.hbm_to_vmem [thread:$0]  (!%p1098_p11), %s1235_s1, 512, %s227_s7, [#allocation8], %s999_s12, %s999_s12, %s1000_s13  }
  0x28   : > { %p879_p10 = pnand %p878_p5, %p872_p0 }
  0x2a   : > { %882 = shalt.err (!%p879_p10)
}
  0x2b   : > { %760 = dma.hbm_to_vmem [thread:$0]  (!%p1098_p11), %s1221_s2, 512, %s244_s10, [#allocation8], %s999_s12, %s999_s12, %s1000_s13  }
  0x2c   : > { %s41_s25 = sadd.s32 1, %s991_s22  ;;  %s50_s6 = sadd.s32 1, %s983_s20 }
  0x2d   : > { %p43_p1 = scmp.ge.s32.totalorder %s41_s25, 2  ;;  %p57_p4 = scmp.ne.s32.totalorder %s983_s20, %s979_s19 }
  0x2e   : > { %p58_p6 = scmp.eq.s32.totalorder %s995_s23, 0  ;;  %p771_p12 = scmp.lt.s32.totalorder %s995_s23, 2 }
  0x2f   : > { %s1248_s25 = smov (%p43_p1, %s41_s25), 0  ;;  %p1130_p7 = por %p1073_p2, %p57_p4 }
  0x30   : > { %p59_p3 = por %p58_p6, %p57_p4  ;;  %s45_s8 = ssub.s32 %s991_s22, %s1248_s25 }
  0x31   : > { %s269_s9 = sand.u32 1, %s983_s20   ;;  %p48_p9 = scmp.eq.s32.totalorder %s45_s8, 0 }
  0x32   : > { %s695_s10 = sshll.u32 %s269_s9, 3  ;;  %s696_s11 = sshll.u32 %s991_s22, 7 }
  0x33   : > { %s1139_s12 = scalar_select %p48_p9, %s983_s20, %s50_s6  }
  0x34   : > { %s279_s15 = scalar_lea.hbm %s1219_s0, %s696_s11  ;;  %s273_s16 = scalar_lea.vmem [#allocation4], %s695_s10 }
  0x35   : > { %s281_s17 = sshll.u32 %s273_s16, 4  ;;  %p1146_p11 = pnand %p771_p12, %p59_p3  ;;  %s282_s17 = int_to_ptr.vmem [resolvable:$true] %s281_s17 }
  0x36   : > { %s270_s24 = scalar_lea.sflag [#allocation5], %s269_s9  ;;  %s896_s8 = scalar_lea.vmem %s282_s17, 128 }
  0x37   : > { %p885_p2 = pneg %p1146_p11  ;;  %p897_p13 = scmp.ne.s32.totalorder %s282_s17, %s896_s8 }
  0x38   : > { %s1001_s6 = smov [#allocation4]  }
  0x39   : > { %p899_p0 = pnand %p897_p13, %p885_p2  ;;  %s901_s1 = sshll.u32 %s1001_s6, 4  ;;  %s902_s1 = int_to_ptr.vmem [resolvable:$false] %s901_s1 }
  0x3a   : > { %s903_s11 = scalar_lea.vmem %s902_s1, 256  ;;  %p904_p10 = scmp.lt.s32.totalorder %s282_s17, %s902_s1 }
  0x3b   : > { %p900_p5 = pneg %p899_p0  ;;  %p905_p1 = scmp.lt.s32.totalorder %s903_s11, %s896_s8 }
  0x3d   : > { %p906_p4 = por %p905_p1, %p904_p10 }
  0x3f   : > { %p907_p6 = pnand %p906_p4, %p900_p5 }
  0x41   : > { %910 = shalt.err (!%p907_p6)
}
  0x42   : > { %764 = dma.hbm_to_vmem [thread:$0]  (!%p1146_p11), %s279_s15, 128, %s282_s17, %s270_s24  }
  0x43   : > { %290 = sbr.rel (%p1089_p8) target bundleno = 316 (0x13c), region = 40  ;;  %s1157_s9 = sand.u32 (!%p1089_p8), 1, %s979_s19  }
  0x44   : > { %s698_s10 = sshll.u32 (!%p1089_p8), %s1157_s9, 3  ;;  %s293_s13 = scalar_lea.sflag (!%p1089_p8), [#allocation5], %s1157_s9 }
  0x45   : > { %s296_s1 = scalar_lea.vmem (!%p1089_p8), [#allocation4], %s698_s10  ;;  %p1238_p12 = scmp.ne.s32.totalorder (!%p1089_p8), %s1231_s28, 0 }
  0x48   : > { %962 = dma.done.wait (%p1238_p12), %s293_s13, 128  }
  0x49   : > { %964 = vsyncadd (%p1238_p12), %s293_s13, 4294967168  ;;  %p1239_p3 = scmp.ne.s32.totalorder %s1229_s26, 0 }
  0x4b   : > { %966 = dma.done.wait (%p1239_p3), [#allocation8], 1024  }
  0x4c   : > { %968 = vsyncadd (%p1239_p3), [#allocation8], 4294966272  ;;  %v1002_v0 = vmov 0.0   ;;  %vm1003_vm0 = vmmov 0   ;;  %v437_v1 = vld [vmem:[#allocation9 + $0x18] sm:$0xff]  ;;  %v436_v2 = vld [vmem:[#allocation9 + $0x10] sm:$0xff] }
  0x4d   : > { %731 = vmatprep.subr.mxu1 %v1002_v0  ;;  %739 = vmatprep.mubr.msk.f32.mxu1 %vm1003_vm0, %v1002_v0  ;;  %v356_v3 = vld [vmem:[#allocation7 + $0x18] sm:$0xff]  ;;  %v435_v4 = vld [vmem:[#allocation9 + $0x8] sm:$0xff]  ;;  %v355_v5 = vld [vmem:[#allocation7 + $0x10] sm:$0xff]  ;;  %vm357_vm1 = vcmask 261120   ;;  %s707_s15 = sshll.u32 %s987_s21, 7  ;;  %s336_s16 = scalar_lea.vmem [#allocation10], %s698_s10 }
  0x4e   : > { %720 = vmatprep.subr.mxu0 %v1002_v0  ;;  %728 = vmatprep.mubr.msk.f32.mxu0 %vm1003_vm0, %v1002_v0  ;;  %v354_v6 = vld [vmem:[#allocation7 + $0x8] sm:$0xff]  ;;  %v434_v7 = vld [vmem:[#allocation9] sm:$0xff]  ;;  %v351_v8 = vld [vmem:[%s296_s1] sm:$0xff]  ;;  %s553_s17 = sshll.u32 %s336_s16, 4  ;;  %s551_s8 = scalar_lea.hbm %s1224_s5, %s707_s15  ;;  %s554_s17 = int_to_ptr.vmem [resolvable:$true] %s553_s17 }
  0x4f   : > { %732 = vmatpush3.msra.mxu1 %v437_v1  ;;  %721 = vmatpush3.msra.mxu0 %v356_v3  ;;  %v353_v9 = vld [vmem:[#allocation7] sm:$0xff]  ;;  %v705_v10 = vld [vmem:[%s1223_s4] ss:$0 sm:$0xff]  ;;  %s539_s6 = scalar_lea.sflag [#allocation6], %s1157_s9  ;;  %s911_s11 = scalar_lea.vmem %s554_s17, 128 }
  0x50   : > { %733 = vmatprep.subr.mxu1 %v1002_v0  ;;  %722 = vmatprep.subr.mxu0 %v1002_v0  ;;  %v704_v17 = vld [vmem:[%s1222_s3] ss:$0 sm:$0xff]  ;;  %p912_p8 = scmp.ne.s32.totalorder %s554_s17, %s911_s11  ;;  %s1004_s13 = smov [#allocation10]  }
  0x51   : > { %734 = vmatpush3.msra.mxu1 %v436_v2  ;;  %723 = vmatpush3.msra.mxu0 %v355_v5  ;;  %s915_s1 = sshll.u32 %s1004_s13, 4  ;;  %s916_s1 = int_to_ptr.vmem [resolvable:$false] %s915_s1 }
  0x52   : > { %735 = vmatprep.subr.mxu1 %v1002_v0  ;;  %724 = vmatprep.subr.mxu0 %v1002_v0  ;;  %p913_p9 = pnand %p912_p8, %p1130_p7  ;;  %s917_s21 = scalar_lea.vmem %s916_s1, 256 }
  0x53   : > { %736 = vmatpush3.msra.mxu1 %v435_v4  ;;  %725 = vmatpush3.msra.mxu0 %v354_v6  ;;  %p918_p2 = scmp.lt.s32.totalorder %s554_s17, %s916_s1  ;;  %p919_p13 = scmp.lt.s32.totalorder %s917_s21, %s911_s11 }
  0x54   : > { %737 = vmatprep.subr.mxu1 %v1002_v0  ;;  %726 = vmatprep.subr.mxu0 %v1002_v0  ;;  %p914_p11 = pneg %p913_p9 }
  0x55   : > { %738 = vmatpush3.msra.mxu1 %v434_v7  ;;  %727 = vmatpush3.msra.mxu0 %v353_v9  ;;  %p920_p0 = por %p919_p13, %p918_p2 }
  0x56   : > { %740 = vmatmul.mubr.msk.f32.vlgmr.msra.gmra.mxu1 %vm357_vm1, %v351_v8  ;;  %729 = vmatmul.mubr.msk.f32.vlgmr.msra.gmra.mxu0 %vm357_vm1, %v351_v8 }
  0x57   : > { %p921_p5 = pnand %p920_p0, %p914_p11 }
 0x116   : > { %v504_v11 = vpop.f32.mrf.mxu1  ;;  %v427_v13 = vpop.f32.mrf.mxu0 }
 0x117   : > { %v530_v12 = vadd.f32 %v705_v10, %v504_v11  ;;  %v521_v20 = vadd.f32 %v704_v17, %v427_v13 }
 0x118   : > { %v741_v14 = vpop.f32.mrf.mxu1  ;;  %v730_v16 = vpop.f32.mrf.mxu0 }
 0x119   : > { %v532_v15 = vmul.f32 0.70710677, %v530_v12  ;;  %v531_v19 = vmul.f32 0.5, %v530_v12 }
 0x11b   : > { %829 = verf.f32 %v532_v15 }
 0x128   : > { %v830_v18 = vpop.eup %829 }
 0x129   : > { %v534_v21 = vadd.f32 1.0, %v830_v18 }
 0x12b   : > { %v535_v22 = vmul.f32 %v534_v21, %v531_v19 }
 0x12d   : > { %v536_v23 = vmul.f32 %v535_v22, %v521_v20 }
 0x12f   : > { %537 = vst [vmem:[%s336_s16] sm:$0xff] %v536_v23 }
 0x130   : > { %924 = shalt.err (!%p921_p5)
}
 0x131   : > { %s925_s10 = scalar_lea.hbm %s551_s8, 128  ;;  %s929_s28 = scalar_lea.hbm %s1224_s5, 256 }
 0x132   : > { %p926_p10 = scmp.ne.s32.totalorder %s551_s8, %s925_s10  ;;  %p930_p6 = scmp.lt.s32.totalorder %s551_s8, %s1224_s5 }
 0x133   : > { %p931_p12 = scmp.lt.s32.totalorder %s929_s28, %s925_s10 }
 0x134   : > { %p927_p1 = pnand %p926_p10, %p1130_p7 }
 0x135   : > { %p932_p3 = por %p931_p12, %p930_p6 }
 0x136   : > { %p928_p4 = pneg %p927_p1 }
 0x138   : > { %p933_p8 = pnand %p932_p3, %p928_p4 }
 0x13a   : > { %936 = shalt.err (!%p933_p8)
}
 0x13b   : > { %752 = dma.vmem_to_hbm [thread:$0]  (%p1130_p7), %s554_s17, 128, %s551_s8, %s539_s6  }
 0x13c PF: > { %s565_s15 = sand.u32 1, %s975_s18   ;;  %p1240_p9 = scmp.ne.s32.totalorder %s1232_s29, 0 }
 0x13d   : > { %p1241_p11 = scmp.ge.s32.totalorder %s995_s23, 2  ;;  %s566_s16 = scalar_lea.sflag [#allocation6], %s565_s15 }
 0x13f   : > { %p766_p2 = pnand %p1241_p11, %p1240_p9 }
 0x141   : > { %p767_p13 = pneg %p766_p2 }
 0x143   : > { %970 = dma.done.wait (%p767_p13), %s566_s16, 128  }
 0x144   : > { %972 = vsyncadd (%p767_p13), %s566_s16, 4294967168  ;;  %s22_s23 = sadd.s32 1, %s995_s23   ;;  %s1242_s18 = smov %s979_s19 }
 0x145   : > { %p19_p0 = scmp.ge.s32.totalorder %s22_s23, 4   ;;  %s1243_s19 = smov %s983_s20 }
 0x146   : > { %s1244_s20 = smov %s1139_s12  ;;  %s1245_s21 = smov %s991_s22 }
 0x147   : > { %s1246_s22 = smov %s1248_s25  ;;  %21 = sbr.rel (!%p19_p0) target bundleno = 9 (0x9), region = 109 }
 0x14c   :  { %571 = vsyncpa [#allocation5], 1 }
 0x14d   :  { %573 = vsyncpa [#allocation5 + $0x1], 1 }
 0x14e   :  { %574 = vsyncpa [#allocation8], 1 }
 0x14f   :  { %575 = vsyncpa [#allocation6], 1 }
 0x150   :  { %577 = vsyncpa [#allocation6 + $0x1], 1 }

</bundles_post_ra>
